<compile_context>
chip_gen: v6e
topology: v6e:2x2x1
jax: 0.10.0
libtpu: 0.0.40
codegen_flags: <defaults>
</compile_context>

<pallas_src>
import jax
import jax.numpy as jnp
from jax.experimental import pallas as pl
from jax.experimental.pallas import tpu as pltpu


def _round_up(x, m):
    return ((x + m - 1) // m) * m


def gcn_kernel(a_ref, x_ref, w_ref, b_ref, o_ref, acc_ref, den_ref):
    # a_ref: (S, nt, nk)    x_ref: (nk, F_p)    w_ref: (S*F_p, O_p)
    # b_ref: (nt, O_p) f32  o_ref: (nt, O_p) f32
    # acc_ref: (S*nt, F_p) f32 scratch    den_ref: (S*nt, 1) f32 scratch
    S, nt, nk = a_ref.shape
    F_p = x_ref.shape[1]
    k = pl.program_id(2)

    @pl.when(k == 0)
    def _():
        acc_ref[...] = jnp.zeros_like(acc_ref)
        den_ref[...] = jnp.zeros_like(den_ref)

    # ---- stage 1: one fused MXU matmul over all S supports (partial over k) --
    a2d = a_ref[...].reshape(S * nt, nk)                       # layout no-op (nt%8==0)
    acc_ref[...] += jnp.dot(a2d, x_ref[...],
                            preferred_element_type=jnp.float32)
    # partial L1 row-norm denominator (accumulated across k steps).
    # TODO(synk): for nonnegative adjacency this could be folded into the
    # stage-1 matmul via a ones-column on X, making the row sums free.
    den_ref[...] += jnp.sum(jnp.abs(a2d).astype(jnp.float32),
                            axis=-1, keepdims=True)

    @pl.when(k == pl.num_programs(2) - 1)
    def _():
        # deferred L1 normalization: diag(1/denom) @ (A @ X)  ==  (A/denom) @ X
        inv = pl.reciprocal(jnp.maximum(den_ref[...], 1e-12), approx=False)
        sup = (acc_ref[...] * inv).astype(w_ref.dtype)         # (S*nt, F_p)

        # ---- stage 2: sum_s (A_s @ X) @ W_s  (block-row slices of W) ---------
        out = jnp.dot(sup[0:nt, :], w_ref[0:F_p, :],
                      preferred_element_type=jnp.float32)
        for s in range(1, S):
            out += jnp.dot(sup[s * nt:(s + 1) * nt, :],
                           w_ref[s * F_p:(s + 1) * F_p, :],
                           preferred_element_type=jnp.float32)

        # ---- fused bias add + single lane-dense store ------------------------
        o_ref[...] = (out + b_ref[...]).astype(o_ref.dtype)


def prepare_gcn_params(W, b, *, support, input_dim,
                       compute_dtype=jnp.float32, lane_pad=128):
    """One-time parameter prep (hoisted out of the per-call path).

    Re-packs W from (S*F, O) to (S*F_p, O_p) with zero-padded F/O lanes and
    casts it to compute_dtype; pads bias columns (bias stays f32).
    lane_pad=256 can be used on v6e/v7x once compute-bound (2x256 MXUs).
    """
    SF, O = W.shape
    assert SF == support * input_dim
    F_p = _round_up(input_dim, lane_pad)
    O_p = _round_up(O, lane_pad)
    W3 = W.reshape(support, input_dim, O)
    W3 = jnp.pad(W3, ((0, 0), (0, F_p - input_dim), (0, O_p - O)))
    W_p = W3.reshape(support * F_p, O_p).astype(compute_dtype)
    b_p = jnp.pad(b, ((0, 0), (0, O_p - O))).astype(jnp.float32)
    return dict(W=W_p, b=b_p, S=support, F=input_dim, F_p=F_p, O=O, O_p=O_p)


def _pick_tiles(N, S, itemsize, a_block_budget=4 << 20):
    """Choose (N_p, nt, nk). Keep the double-buffered A block small (<=~4MiB)
    so the kernel fits v7x's 64 MiB VMEM and leaves room for pipelining."""
    if S * N * N * itemsize <= a_block_budget:
        return N, N, N                      # full blocks, no padding / k-split
    N_p = _round_up(N, 128)
    nk = 512 if N_p % 512 == 0 else (256 if N_p % 256 == 0 else 128)
    nt = 128
    for cand in (1024, 512, 256, 128):      # prefer big row tiles (HBM roofline)
        if N_p % cand == 0 and S * cand * nk * itemsize <= a_block_budget:
            nt = cand
            break
    return N_p, nt, nk


def graph_convolution(features, a_list, params, *, nt=None, nk=None,
                      vmem_limit_bytes=None, unpad_output=True):
    """Pallas forward. Grid = (batch, node-row tiles, contraction tiles)."""
    W_p, b_full = params["W"], params["b"]
    S, F, F_p = params["S"], params["F"], params["F_p"]
    O, O_p = params["O"], params["O_p"]

    B, N, Fin = features.shape
    assert Fin == F
    assert a_list.shape[0] == B and a_list.shape[1] >= S
    assert a_list.shape[2] == N and a_list.shape[3] == N
    # TODO(synk): bias assumes max_node_num >= node_num; original module only
    # works when they are equal (plain `output += self.b`).
    assert b_full.shape[0] >= N

    compute_dtype = W_p.dtype
    itemsize = jnp.dtype(compute_dtype).itemsize

    # ---- tile selection ------------------------------------------------------
    if nt is None and nk is None:
        N_p, nt, nk = _pick_tiles(N, S, itemsize)
    else:
        nt = N if nt is None else nt
        nk = N if nk is None else nk
        N_p = N if (nt == N and nk == N) else _round_up(N, 128)
    assert N_p % nt == 0 and N_p % nk == 0, "nt/nk must divide padded N"
    if nt != N_p:
        assert nt % 8 == 0
    if nk != N_p:
        assert nk % 128 == 0

    # ---- per-call input prep (pads only when actually needed) ---------------
    a_in = a_list if a_list.shape[1] == S else a_list[:, :S]
    x_in = features
    if F_p != F:
        x_in = jnp.pad(x_in, ((0, 0), (0, 0), (0, F_p - F)))
    b_in = b_full[:N]
    if N_p != N:
        x_in = jnp.pad(x_in, ((0, 0), (0, N_p - N), (0, 0)))
        a_in = jnp.pad(a_in, ((0, 0), (0, 0), (0, N_p - N), (0, N_p - N)))
        b_in = jnp.pad(b_in, ((0, N_p - N), (0, 0)))
    a_in = a_in.astype(compute_dtype)
    x_in = x_in.astype(compute_dtype)

    # ---- VMEM budget (double-buffered blocks + scratch, with headroom) ------
    if vmem_limit_bytes is None:
        a_blk = S * nt * nk * itemsize
        x_blk = nk * F_p * itemsize
        w_blk = S * F_p * O_p * itemsize
        b_blk = nt * O_p * 4
        o_blk = nt * O_p * 4
        scratch = S * nt * F_p * 4 + S * nt * 128 * 4
        est = 2 * (a_blk + x_blk + w_blk + b_blk + o_blk) + scratch
        vmem_limit_bytes = int(min(max(2 * est, 32 << 20), 96 << 20))

    grid = (B, N_p // nt, N_p // nk)

    out = pl.pallas_call(
        gcn_kernel,
        out_shape=jax.ShapeDtypeStruct((B, N_p, O_p), jnp.float32),
        grid=grid,
        in_specs=[
            # A_list: batch squeezed, row tile jn, contraction tile k
            pl.BlockSpec((None, S, nt, nk), lambda ib, jn, k: (ib, 0, jn, k)),
            # features: batch squeezed, contraction tile k, full (padded) F
            pl.BlockSpec((None, nk, F_p), lambda ib, jn, k: (ib, k, 0)),
            # W: shared, resident (constant block index -> no re-fetch)
            pl.BlockSpec((S * F_p, O_p), lambda ib, jn, k: (0, 0)),
            # bias: row tile jn
            pl.BlockSpec((nt, O_p), lambda ib, jn, k: (jn, 0)),
        ],
        out_specs=pl.BlockSpec((None, nt, O_p), lambda ib, jn, k: (ib, jn, 0)),
        scratch_shapes=[
            pltpu.VMEM((S * nt, F_p), jnp.float32),   # partial A@X accumulator
            pltpu.VMEM((S * nt, 1), jnp.float32),     # partial |A| row-sum
        ],
        compiler_params=pltpu.CompilerParams(
            dimension_semantics=("parallel", "parallel", "arbitrary"),
            vmem_limit_bytes=vmem_limit_bytes),
    )(a_in, x_in, W_p, b_in)

    # For chained GCN layers keep the padded (N_p, O_p) layout and set
    # unpad_output=False (the slice is an extra full HBM pass).
    if unpad_output and (N_p != N or O_p != O):
        out = out[:, :N, :O]
    return out


def ref_forward(features, a_list, W, b):
    """Pure-JAX reference mirroring the PyTorch forward (featureless=False)."""
    denom = jnp.maximum(jnp.sum(jnp.abs(a_list), axis=3, keepdims=True), 1e-12)
    a_n = a_list / denom
    sup = jnp.einsum("bsnm,bmf->bnsf", a_n, features)   # matmul + transpose(1,2)
    B, N, S, F = sup.shape
    return sup.reshape(B, N, S * F) @ W + b


if __name__ == "__main__":
    # ---- Test 1: small shapes, full-block path, f32, tight tolerance --------
    B, S, N = 4, 2, 16           # batch, support, nodes (max_node_num == N)
    Fdim, Odim = 32, 32          # input_dim, output_dim
    k1, k2, k3, k4 = jax.random.split(jax.random.PRNGKey(0), 4)
    features = jax.random.normal(k1, (B, N, Fdim), dtype=jnp.float32)
    a_list = jax.random.uniform(k2, (B, S, N, N), dtype=jnp.float32)
    # Deterministic kaiming_normal-like init (gain sqrt(2)).
    W = jax.random.normal(k3, (S * Fdim, Odim), jnp.float32) * jnp.sqrt(2.0 / Odim)
    b = jax.random.normal(k4, (N, Odim), jnp.float32) * jnp.sqrt(2.0 / Odim)

    params_f32 = prepare_gcn_params(W, b, support=S, input_dim=Fdim)
    out = jax.block_until_ready(graph_convolution(features, a_list, params_f32))
    ref = ref_forward(features, a_list, W, b)
    assert out.shape == (B, N, Odim)
    assert jnp.allclose(out, ref, atol=1e-5, rtol=1e-5), "f32 full-block mismatch"

    # ---- Test 2: forced row/k tiling + N padding (exercises accumulators) ---
    B2, S2, N2, F2, O2 = 2, 2, 200, 64, 96
    j1, j2, j3, j4 = jax.random.split(jax.random.PRNGKey(1), 4)
    f2 = jax.random.normal(j1, (B2, N2, F2), dtype=jnp.float32)
    a2 = jax.random.uniform(j2, (B2, S2, N2, N2), dtype=jnp.float32)
    W2 = jax.random.normal(j3, (S2 * F2, O2), jnp.float32) * jnp.sqrt(2.0 / O2)
    b2 = jax.random.normal(j4, (N2, O2), jnp.float32) * jnp.sqrt(2.0 / O2)
    params2 = prepare_gcn_params(W2, b2, support=S2, input_dim=F2)
    out2 = jax.block_until_ready(
        graph_convolution(f2, a2, params2, nt=128, nk=128))
    ref2 = ref_forward(f2, a2, W2, b2)
    assert out2.shape == (B2, N2, O2)
    assert jnp.allclose(out2, ref2, atol=1e-4, rtol=1e-4), "tiled-path mismatch"

    # ---- Test 3: bf16 inputs/weights, f32 accumulation (relaxed tolerance) --
    params_bf16 = prepare_gcn_params(W, b, support=S, input_dim=Fdim,
                                     compute_dtype=jnp.bfloat16)
    out_bf = jax.block_until_ready(graph_convolution(features, a_list, params_bf16))
    assert jnp.allclose(out_bf, ref, atol=1e-1, rtol=5e-2), "bf16-path mismatch"

    # TODO(synk): featureless=True branch not implemented — original PyTorch
    # code references undefined self.num_nodes (bug); num_bases>0 (basis
    # decomposition) path also omitted; activation is never applied in forward.
    print("KERNEL_OK")
</pallas_src>

<mosaic_0001>
module attributes {stable_mosaic.version = 11 : i64} {
  func.func @gcn_kernel(%arg0: i32, %arg1: i32, %arg2: i32, %arg3: memref<1x2x16x16xf32, #tpu.memory_space<vmem>>, %arg4: memref<1x16x128xf32, #tpu.memory_space<vmem>>, %arg5: memref<256x128xf32, #tpu.memory_space<vmem>>, %arg6: memref<16x128xf32, #tpu.memory_space<vmem>>, %arg7: memref<1x16x128xf32, #tpu.memory_space<vmem>>, %arg8: memref<32x128xf32, #tpu.memory_space<vmem>>, %arg9: memref<32x1xf32, #tpu.memory_space<vmem>>) attributes {dimension_semantics = [#tpu.dimension_semantics<parallel>, #tpu.dimension_semantics<parallel>, #tpu.dimension_semantics<arbitrary>], iteration_bounds = array<i64: 4, 1, 1>, scalar_prefetch = 0 : i64, scratch_operands = 2 : i64, tpu.core_type = #tpu.core_type<tc>, window_params = [{transform_indices = @transform_0, window_bounds = array<i64: 1, 2, 16, 16>}, {transform_indices = @transform_1, window_bounds = array<i64: 1, 16, 128>}, {pipeline_mode = #tpu.pipeline_mode<synchronous>, transform_indices = @transform_2, window_bounds = array<i64: 256, 128>}, {transform_indices = @transform_3, window_bounds = array<i64: 16, 128>}, {transform_indices = @transform_4, window_bounds = array<i64: 1, 16, 128>}]} {
    %c0_i32 = arith.constant 0 : i32
    %0 = arith.cmpi eq, %arg2, %c0_i32 : i32
    %1 = arith.extui %0 : i1 to i32
    %c0_i32_0 = arith.constant 0 : i32
    %2 = arith.cmpi ne, %1, %c0_i32_0 : i32
    scf.if %2 {
      %cst_18 = arith.constant 0.000000e+00 : f32
      %21 = vector.broadcast %cst_18 : f32 to vector<32x128xf32>
      %c0_19 = arith.constant 0 : index
      %c0_20 = arith.constant 0 : index
      %22 = vector.load %arg8[%c0_19, %c0_20] : memref<32x128xf32, #tpu.memory_space<vmem>>, vector<32x128xf32>
      tpu.vector_store %arg8[%c0_19, %c0_20], %21 {strides = array<i32>} : memref<32x128xf32, #tpu.memory_space<vmem>>, vector<32x128xf32>,
      %cst_21 = arith.constant 0.000000e+00 : f32
      %23 = vector.broadcast %cst_21 : f32 to vector<32x1xf32>
      %c0_22 = arith.constant 0 : index
      %c0_23 = arith.constant 0 : index
      %24 = vector.load %arg9[%c0_22, %c0_23] : memref<32x1xf32, #tpu.memory_space<vmem>>, vector<32x1xf32>
      tpu.vector_store %arg9[%c0_22, %c0_23], %23 {strides = array<i32>} : memref<32x1xf32, #tpu.memory_space<vmem>>, vector<32x1xf32>,
    } else {
    }
    %c0 = arith.constant 0 : index
    %c0_1 = arith.constant 0 : index
    %c0_2 = arith.constant 0 : index
    %c0_3 = arith.constant 0 : index
    %3 = vector.load %arg3[%c0, %c0_1, %c0_2, %c0_3] : memref<1x2x16x16xf32, #tpu.memory_space<vmem>>, vector<1x2x16x16xf32>
    %4 = vector.shape_cast %3 : vector<1x2x16x16xf32> to vector<2x16x16xf32>
    %5 = vector.shape_cast %4 : vector<2x16x16xf32> to vector<32x16xf32>
    %c0_4 = arith.constant 0 : index
    %c0_5 = arith.constant 0 : index
    %6 = vector.load %arg8[%c0_4, %c0_5] : memref<32x128xf32, #tpu.memory_space<vmem>>, vector<32x128xf32>
    %c0_6 = arith.constant 0 : index
    %c0_7 = arith.constant 0 : index
    %c0_8 = arith.constant 0 : index
    %7 = vector.load %arg4[%c0_6, %c0_7, %c0_8] : memref<1x16x128xf32, #tpu.memory_space<vmem>>, vector<1x16x128xf32>
    %8 = vector.shape_cast %7 : vector<1x16x128xf32> to vector<16x128xf32>
    %cst = arith.constant dense<0.000000e+00> : vector<32x128xf32>
    %9 = tpu.matmul %5, %8, %cst {dimension_numbers = #tpu.dot_dimension_numbers<[1], [0], [0], [1], [0, 0, 1, 1], [], []>} : vector<32x16xf32>, vector<16x128xf32>, vector<32x128xf32> -> vector<32x128xf32>
    %10 = arith.addf %6, %9 : vector<32x128xf32>
    %c0_9 = arith.constant 0 : index
    %c0_10 = arith.constant 0 : index
    %11 = vector.load %arg8[%c0_9, %c0_10] : memref<32x128xf32, #tpu.memory_space<vmem>>, vector<32x128xf32>
    tpu.vector_store %arg8[%c0_9, %c0_10], %10 {strides = array<i32>} : memref<32x128xf32, #tpu.memory_space<vmem>>, vector<32x128xf32>,
    %c0_11 = arith.constant 0 : index
    %c0_12 = arith.constant 0 : index
    %12 = vector.load %arg9[%c0_11, %c0_12] : memref<32x1xf32, #tpu.memory_space<vmem>>, vector<32x1xf32>
    %13 = math.absf %5 : vector<32x16xf32>
    %cst_13 = arith.constant dense<0.000000e+00> : vector<32xf32>
    %14 = vector.multi_reduction <add>, %13, %cst_13 [1] : vector<32x16xf32> to vector<32xf32>
    %15 = vector.shape_cast %14 : vector<32xf32> to vector<32x1xf32>
    %16 = arith.addf %12, %15 : vector<32x1xf32>
    %c0_14 = arith.constant 0 : index
    %c0_15 = arith.constant 0 : index
    %17 = vector.load %arg9[%c0_14, %c0_15] : memref<32x1xf32, #tpu.memory_space<vmem>>, vector<32x1xf32>
    tpu.vector_store %arg9[%c0_14, %c0_15], %16 {strides = array<i32>} : memref<32x1xf32, #tpu.memory_space<vmem>>, vector<32x1xf32>,
    %c0_i32_16 = arith.constant 0 : i32
    %18 = arith.cmpi eq, %arg2, %c0_i32_16 : i32
    %19 = arith.extui %18 : i1 to i32
    %c0_i32_17 = arith.constant 0 : i32
    %20 = arith.cmpi ne, %19, %c0_i32_17 : i32
    scf.if %20 {
      %c0_18 = arith.constant 0 : index
      %c0_19 = arith.constant 0 : index
      %21 = vector.load %arg9[%c0_18, %c0_19] : memref<32x1xf32, #tpu.memory_space<vmem>>, vector<32x1xf32>
      %cst_20 = arith.constant 9.99999996E-13 : f32
      %22 = vector.broadcast %cst_20 : f32 to vector<32x1xf32>
      %23 = arith.maximumf %21, %22 : vector<32x1xf32>
      %24 = tpu.reciprocal %23 : vector<32x1xf32> -> vector<32x1xf32>
      %c0_21 = arith.constant 0 : index
      %c0_22 = arith.constant 0 : index
      %25 = vector.load %arg8[%c0_21, %c0_22] : memref<32x128xf32, #tpu.memory_space<vmem>>, vector<32x128xf32>
      %26 = vector.broadcast %24 : vector<32x1xf32> to vector<32x128xf32>
      %27 = arith.mulf %25, %26 : vector<32x128xf32>
      %28 = vector.extract_strided_slice %27 {offsets = [0, 0], sizes = [16, 128], strides = [1, 1]} : vector<32x128xf32> to vector<16x128xf32>
      %c0_23 = arith.constant 0 : index
      %c0_24 = arith.constant 0 : index
      %29 = vector.load %arg5[%c0_23, %c0_24] : memref<256x128xf32, #tpu.memory_space<vmem>>, vector<128x128xf32>
      %cst_25 = arith.constant dense<0.000000e+00> : vector<16x128xf32>
      %30 = tpu.matmul %28, %29, %cst_25 {dimension_numbers = #tpu.dot_dimension_numbers<[1], [0], [0], [1], [0, 0, 1, 1], [], []>} : vector<16x128xf32>, vector<128x128xf32>, vector<16x128xf32> -> vector<16x128xf32>
      %31 = vector.extract_strided_slice %27 {offsets = [16, 0], sizes = [16, 128], strides = [1, 1]} : vector<32x128xf32> to vector<16x128xf32>
      %c128 = arith.constant 128 : index
      %c0_26 = arith.constant 0 : index
      %32 = vector.load %arg5[%c128, %c0_26] : memref<256x128xf32, #tpu.memory_space<vmem>>, vector<128x128xf32>
      %cst_27 = arith.constant dense<0.000000e+00> : vector<16x128xf32>
      %33 = tpu.matmul %31, %32, %cst_27 {dimension_numbers = #tpu.dot_dimension_numbers<[1], [0], [0], [1], [0, 0, 1, 1], [], []>} : vector<16x128xf32>, vector<128x128xf32>, vector<16x128xf32> -> vector<16x128xf32>
      %34 = arith.addf %30, %33 : vector<16x128xf32>
      %c0_28 = arith.constant 0 : index
      %c0_29 = arith.constant 0 : index
      %35 = vector.load %arg6[%c0_28, %c0_29] : memref<16x128xf32, #tpu.memory_space<vmem>>, vector<16x128xf32>
      %36 = arith.addf %34, %35 : vector<16x128xf32>
      %c0_30 = arith.constant 0 : index
      %c0_31 = arith.constant 0 : index
      %c0_32 = arith.constant 0 : index
      %37 = vector.load %arg7[%c0_30, %c0_31, %c0_32] : memref<1x16x128xf32, #tpu.memory_space<vmem>>, vector<1x16x128xf32>
      %38 = vector.shape_cast %37 : vector<1x16x128xf32> to vector<16x128xf32>
      %39 = vector.shape_cast %36 : vector<16x128xf32> to vector<1x16x128xf32>
      tpu.vector_store %arg7[%c0_30, %c0_31, %c0_32], %39 {strides = array<i32>} : memref<1x16x128xf32, #tpu.memory_space<vmem>>, vector<1x16x128xf32>,
    } else {
    }
    return
  }
  func.func @transform_0(%arg0: i32, %arg1: i32, %arg2: i32) -> (i32, i32, i32, i32) {
    %c0_i32 = arith.constant 0 : i32
    %c0_i32_0 = arith.constant 0 : i32
    return %arg0, %c0_i32, %arg1, %arg2 : i32, i32, i32, i32
  }
  func.func @transform_1(%arg0: i32, %arg1: i32, %arg2: i32) -> (i32, i32, i32) {
    %c0_i32 = arith.constant 0 : i32
    %c0_i32_0 = arith.constant 0 : i32
    return %arg0, %arg2, %c0_i32 : i32, i32, i32
  }
  func.func @transform_2(%arg0: i32, %arg1: i32, %arg2: i32) -> (i32, i32) {
    %c0_i32 = arith.constant 0 : i32
    %c0_i32_0 = arith.constant 0 : i32
    %c0_i32_1 = arith.constant 0 : i32
    return %c0_i32, %c0_i32_0 : i32, i32
  }
  func.func @transform_3(%arg0: i32, %arg1: i32, %arg2: i32) -> (i32, i32) {
    %c0_i32 = arith.constant 0 : i32
    %c0_i32_0 = arith.constant 0 : i32
    return %arg1, %c0_i32 : i32, i32
  }
  func.func @transform_4(%arg0: i32, %arg1: i32, %arg2: i32) -> (i32, i32, i32) {
    %c0_i32 = arith.constant 0 : i32
    %c0_i32_0 = arith.constant 0 : i32
    return %arg0, %arg1, %c0_i32 : i32, i32, i32
  }
}

</mosaic_0001>

<bundles_post_ra>
// kernel: tpu_custom_call.1
= control target key start
LH: loop header
LB: loop body
LE: loop exit
PB: predicated region body
PF: predicated region fallthrough
CT: control target
= control target key end

     0   :  { %s1608_s0 = inlined_call_operand.hbm [shape: f32[4,2,16,16], index: 0, kind: input, shape index: {}]   ;;  %s1609_s1 = inlined_call_operand.hbm [shape: f32[4,16,128], index: 1, kind: input, shape index: {}]   ;;  %s1610_s2 = inlined_call_operand.hbm [shape: f32[256,128], index: 2, kind: input, shape index: {}]   ;;  %s1611_s3 = inlined_call_operand.hbm [shape: f32[16,128], index: 3, kind: input, shape index: {}]   ;;  %s1612_s4 = inlined_call_operand.hbm [shape: f32[4,16,128], index: 4, kind: output, shape index: {}]  }
   0x1   :  { %1617 = sst [smem:[#allocation21_spill]] %s1608_s0 }
   0x2   :  { %1618 = sst [smem:[#allocation22_spill]] %s1610_s2 }
   0x3   :  { %1619 = sst [smem:[#allocation23_spill]] %s1611_s3 }
   0x4   :  { %9 = vsyncpa [#allocation5], 0 }
   0x5   :  { %11 = vsyncpa [#allocation5 + $0x1], 0 }
   0x6   :  { %12 = vsyncpa [#allocation8], 0 }
   0x7   :  { %14 = vsyncpa [#allocation8 + $0x1], 0 }
   0x8   :  { %15 = vsyncpa [#allocation11], 0 }
   0x9   :  { %16 = vsyncpa [#allocation6], 0 }
   0xa   :  { %18 = vsyncpa [#allocation6 + $0x1], 0  ;;  %s1366_s15 = smov 0   ;;  %s1368_s16 = smov 0  }
   0xb   :  { %s1370_s17 = smov 0   ;;  %s1372_s18 = smov 0  }
   0xc   :  { %s1374_s19 = smov 0   ;;  %s1376_s20 = smov 0  }
   0xd LB: > { %1620 = sst [smem:[#allocation18_spill]] %s1316_s17  ;;  %s1397_s21 = sadd.s32 4294967295, %s1328_s20   ;;  %s1328_s20 = sphi %s1376_s20, %s24_s20   ;;  %s1324_s19 = sphi %s1374_s19, %s1639_s19   ;;  %s1320_s18 = sphi %s1372_s18, %s1638_s18   ;;  %s1316_s17 = sphi %s1370_s17, %s1634_s17   ;;  %s1312_s16 = sphi %s1368_s16, %s1637_s16   ;;  %s1308_s15 = sphi %s1366_s15, %s1636_s15  }
   0xe   : > { %s873_s22 = sadd.s32 4294967294, %s1328_s20   ;;  %p67_p0 = scmp.ne.s32.totalorder %s1312_s16, %s1308_s15 }
   0xf   : > { %p68_p1 = scmp.eq.s32.totalorder %s1397_s21, 0  ;;  %p168_p2 = scmp.eq.s32.totalorder %s1397_s21, 3 }
  0x10   : > { %p174_p3 = scmp.eq.s32.totalorder %s873_s22, 3  ;;  %p874_p5 = scmp.ge.s32.totalorder %s1328_s20, 1 }
  0x11   : > { %p1406_p4 = por %p68_p1, %p67_p0  ;;  %p181_p7 = scmp.lt.s32.totalorder %s1328_s20, 5 }
  0x12   : > { %p1411_p6 = por %p174_p3, %p67_p0  ;;  %s1330_s26 = smov [#allocation9]  }
  0x13   : > { %p1416_p8 = pnand %p874_p5, %p181_p7  ;;  %s193_s27 = sshll.u32 %s1330_s26, 4  ;;  %s194_s27 = int_to_ptr.vmem [resolvable:$true] %s193_s27 }
  0x14   : > { %s1331_s29 = smov [#allocation10]   ;;  %s1139_s5 = scalar_lea.vmem %s194_s27, 4096 }
  0x15   : > { %p1038_p9 = pneg %p1416_p8  ;;  %s209_s30 = sshll.u32 %s1331_s29, 4  ;;  %s210_s30 = int_to_ptr.vmem [resolvable:$true] %s209_s30 }
  0x16   : > { %p1140_p12 = scmp.ne.s32.totalorder %s194_s27, %s1139_s5  ;;  %p1147_p3 = scmp.lt.s32.totalorder %s194_s27, %s194_s27 }
  0x17   : > { %p1424_p10 = pnand %p1038_p9, %p68_p1  ;;  %p1148_p5 = scmp.lt.s32.totalorder %s1139_s5, %s1139_s5 }
  0x19   : > { %p1130_p11 = pneg %p1424_p10  ;;  %p1149_p7 = por %p1148_p5, %p1147_p3 }
  0x1b   : > { %p1142_p13 = pnand %p1140_p12, %p1130_p11 }
  0x1d   : > { %p1143_p0 = pneg %p1142_p13 }
  0x1f   : > { %p1150_p9 = pnand %p1149_p7, %p1143_p0 }
  0x21   : > { %1153 = shalt.err (!%p1150_p9)
}
  0x22   : > { %s1613_s6 = smov 128   ;;  %s1333_s7 = smov 8  }
  0x23   : > { %s1625_s2 = sld [smem:[#allocation22_spill]]  ;;  %s1165_s10 = scalar_lea.vmem %s210_s30, 256 }
  0x24   : > { %p1166_p12 = scmp.ne.s32.totalorder %s210_s30, %s1165_s10  ;;  %p1173_p0 = scmp.lt.s32.totalorder %s210_s30, %s210_s30 }
  0x25   : > { %p1174_p5 = scmp.lt.s32.totalorder %s1165_s10, %s1165_s10 }
  0x26   : > { %p1168_p13 = pnand %p1166_p12, %p1130_p11 }
  0x27   : > { %p1175_p7 = por %p1174_p5, %p1173_p0 }
  0x28   : > { %p1169_p3 = pneg %p1168_p13 }
  0x29   : > { %1041 = dma.hbm_to_vmem [thread:$0]  (!%p1424_p10), %s1625_s2, 4096, %s194_s27, [#allocation8], %s1613_s6, %s1613_s6, %s1333_s7  }
  0x2a   : > { %p1176_p9 = pnand %p1175_p7, %p1169_p3 }
  0x2c   : > { %1179 = shalt.err (!%p1176_p9)
}
  0x2d   : > { %s1626_s3 = sld [smem:[#allocation23_spill]]  ;;  %s43_s13 = sadd.s32 1, %s1324_s19 }
  0x2e   : > { %s54_s14 = sadd.s32 1, %s1316_s17  ;;  %p45_p11 = scmp.ge.s32.totalorder %s43_s13, 4 }
  0x2f   : > { %p61_p12 = scmp.ne.s32.totalorder %s1316_s17, %s1312_s16  ;;  %p62_p13 = scmp.eq.s32.totalorder %s1328_s20, 0 }
  0x30   : > { %p1058_p3 = scmp.lt.s32.totalorder %s1328_s20, 4  ;;  %s1641_s13 = smov (%p45_p11, %s43_s13), 0 }
  0x31   : > { %1627 = sst [smem:[#allocation19_spill]] %s1641_s13  ;;  %p63_p0 = por %p62_p13, %p61_p12 }
  0x32   : > { %p1462_p5 = por %p168_p2, %p61_p12  ;;  %s47_s26 = ssub.s32 %s1324_s19, %s1641_s13 }
  0x33   : > { %1044 = dma.hbm_to_vmem [thread:$0]  (!%p1424_p10), %s1626_s3, 256, %s210_s30, [#allocation11], %s1613_s6, %s1613_s6, %s1333_s7  }
  0x34   : > { %s1469_s27 = sand.u32 1, %s1316_s17   ;;  %p52_p10 = scmp.eq.s32.totalorder %s47_s26, 0 }
  0x35   : > { %s878_s28 = sshll.u32 %s1469_s27, 5  ;;  %s899_s29 = sshll.u32 %s1324_s19, 9 }
  0x36   : > { %s1474_s30 = scalar_select %p52_p10, %s1316_s17, %s54_s14  }
  0x37   : > { %s1630_s0 = sld [smem:[#allocation21_spill]]  ;;  %s227_s10 = scalar_lea.vmem [#allocation4], %s878_s28 }
  0x38   : > { %1629 = sst [smem:[#allocation20_spill]] %s1474_s30  ;;  %s237_s11 = sshll.u32 %s227_s10, 4  ;;  %s238_s11 = int_to_ptr.vmem [resolvable:$true] %s237_s11 }
  0x39   : > { %p1481_p2 = pnand %p1058_p3, %p63_p0  ;;  %s247_s6 = sand.u32 1, %s1328_s20  }
  0x3a   : > { %s224_s26 = scalar_lea.sflag [#allocation5], %s1469_s27  ;;  %s1193_s14 = scalar_lea.vmem %s238_s11, 512 }
  0x3b   : > { %p1182_p7 = pneg %p1481_p2  ;;  %p1194_p9 = scmp.ne.s32.totalorder %s238_s11, %s1193_s14 }
  0x3c   : > { %s1334_s28 = smov [#allocation4]  }
  0x3d   : > { %s236_s9 = scalar_lea.hbm %s1630_s0, %s899_s29  ;;  %p1196_p11 = pnand %p1194_p9, %p1182_p7 }
  0x3e   : > { %s1198_s29 = sshll.u32 %s1334_s28, 4  ;;  %s1199_s29 = int_to_ptr.vmem [resolvable:$false] %s1198_s29 }
  0x3f   : > { %p1197_p12 = pneg %p1196_p11  ;;  %s1200_s5 = scalar_lea.vmem %s1199_s29, 1024 }
  0x40   : > { %p1201_p13 = scmp.lt.s32.totalorder %s238_s11, %s1199_s29  ;;  %p1202_p3 = scmp.lt.s32.totalorder %s1200_s5, %s1193_s14 }
  0x42   : > { %p1203_p0 = por %p1202_p3, %p1201_p13 }
  0x44   : > { %p1204_p10 = pnand %p1203_p0, %p1197_p12 }
  0x46   : > { %1207 = shalt.err (!%p1204_p10)
}
  0x47   : > { %s1632_s8 = smov 128   ;;  %s881_s10 = sshll.u32 %s1469_s27, 4 }
  0x48   : > { %1048 = dma.hbm_to_vmem [thread:$0]  (!%p1481_p2), %s236_s9, 512, %s238_s11, %s224_s26, %s1632_s8, %s1632_s8, %s1333_s7  }
  0x49   : > { %s900_s0 = sshll.u32 %s1324_s19, 8  ;;  %s251_s29 = scalar_lea.vmem [#allocation7], %s881_s10 }
  0x4a   : > { %s259_s3 = scalar_lea.hbm %s1609_s1, %s900_s0  ;;  %s260_s14 = sshll.u32 %s251_s29, 4  ;;  %s261_s14 = int_to_ptr.vmem [resolvable:$true] %s260_s14 }
  0x4b   : > { %s248_s5 = scalar_lea.sflag [#allocation8], %s247_s6  ;;  %s1221_s13 = scalar_lea.vmem %s261_s14, 256 }
  0x4c   : > { %p1222_p9 = scmp.ne.s32.totalorder %s261_s14, %s1221_s13  ;;  %s1335_s30 = smov [#allocation7]  }
  0x4d   : > { %s1226_s17 = sshll.u32 %s1335_s30, 4  ;;  %s1227_s17 = int_to_ptr.vmem [resolvable:$false] %s1226_s17 }
  0x4e   : > { %p1224_p11 = pnand %p1222_p9, %p1182_p7  ;;  %s1228_s9 = scalar_lea.vmem %s1227_s17, 512 }
  0x4f   : > { %p1229_p13 = scmp.lt.s32.totalorder %s261_s14, %s1227_s17  ;;  %p1230_p3 = scmp.lt.s32.totalorder %s1228_s9, %s1221_s13 }
  0x50   : > { %p1225_p12 = pneg %p1224_p11 }
  0x51   : > { %p1231_p0 = por %p1230_p3, %p1229_p13 }
  0x53   : > { %p1232_p10 = pnand %p1231_p0, %p1225_p12 }
  0x55   : > { %1235 = shalt.err (!%p1232_p10)
}
  0x56   : > { %1051 = dma.hbm_to_vmem [thread:$0]  (!%p1481_p2), %s259_s3, 256, %s261_s14, %s248_s5, %s1632_s8, %s1632_s8, %s1333_s7  }
  0x57   : > { %272 = sbr.rel (%p1416_p8) target bundleno = 619 (0x26b), region = 36  ;;  %s1513_s0 = sand.u32 (!%p1416_p8), 1, %s1312_s16  }
  0x58   : > { %s885_s2 = sshll.u32 (!%p1416_p8), %s1513_s0, 5  ;;  %s275_s17 = scalar_lea.sflag (!%p1416_p8), [#allocation5], %s1513_s0 }
  0x59   : > { %s278_s6 = scalar_lea.vmem (!%p1416_p8), [#allocation4], %s885_s2 }
  0x5c   : > { %1287 = dma.done.wait (%p1406_p4), %s275_s17, 512  }
  0x5d   : > { %1289 = vsyncadd (%p1406_p4), %s275_s17, 4294966784  ;;  %s283_s3 = sand.u32 1, %s1397_s21   ;;  %s886_s25 = sshll.u32 %s1513_s0, 4 }
  0x5e   : > { %s284_s7 = scalar_lea.sflag [#allocation8], %s283_s3  ;;  %s287_s13 = scalar_lea.vmem [#allocation7], %s886_s25 }
  0x5f   : > { %1291 = dma.done.wait (%p1406_p4), %s284_s7, 256  }
  0x60   : > { %1293 = vsyncadd (%p1406_p4), %s284_s7, 4294967040 }
  0x61   : > { %1295 = dma.done.wait (%p68_p1), [#allocation8], 4096  }
  0x62   : > { %1297 = vsyncadd (%p68_p1), [#allocation8], 4294963200 }
  0x63   : > { %1299 = dma.done.wait (%p68_p1), [#allocation11], 256  }
  0x64   : > { %1301 = vsyncadd (%p68_p1), [#allocation11], 4294967040  ;;  %vm337_vm0 = vcmask 7168   ;;  %v1336_v0 = vmov 0.0   ;;  %v342_v1 = vld [vmem:[%s278_s6] sm:$0xff]  ;;  %vm352_vm1 = vcmask 130048  }
  0x65   : > { %338 = vst.msk [vmem:[#allocation3] sm:$0xff] %vm337_vm0, %v1336_v0  ;;  %339 = vst.msk [vmem:[#allocation3 + $0x8] sm:$0xff] %vm337_vm0, %v1336_v0  ;;  %v344_v2 = vld [vmem:[%s278_s6 + $0x10] sm:$0xff]  ;;  %v343_v3 = vld [vmem:[%s278_s6 + $0x8] sm:$0xff]  ;;  %v462_v4 = vand.u32 2147483647, %v342_v1  ;;  %948 = vmatprep.mubr.msk.f32.mxu0 %vm352_vm1, %v342_v1 }
  0x66   : > { %340 = vst.msk [vmem:[#allocation3 + $0x10] sm:$0xff] %vm337_vm0, %v1336_v0  ;;  %341 = vst.msk [vmem:[#allocation3 + $0x18] sm:$0xff] %vm337_vm0, %v1336_v0  ;;  %v464_v5 = vand.u32 2147483647, %v344_v2  ;;  %v463_v6 = vand.u32 2147483647, %v343_v3 }
  0x67   : > { %v345_v7 = vld [vmem:[%s278_s6 + $0x18] sm:$0xff]  ;;  %v466_v9 = vsel %vm352_vm1, %v462_v4, 0.0  ;;  %v350_v12 = vld [vmem:[%s287_s13] sm:$0xff]  ;;  %v1337_v15 = vmov 0   ;;  %v543_v20 = vld [vmem:[#allocation9 + $0x68] sm:$0xff]  ;;  %s324_s21 = scalar_lea.vmem [#allocation12], %s886_s25 }
  0x68   : > { %v351_v8 = vld [vmem:[%s287_s13 + $0x8] sm:$0xff]  ;;  %v469_v10 = vsel %vm352_vm1, %v463_v6, 0.0  ;;  %v465_v11 = vand.u32 2147483647, %v345_v7  ;;  %467 = vadd.xlane.f32.xlu0 %v466_v9  ;;  %v472_v13 = vsel %vm352_vm1, %v464_v5, 0.0  ;;  %1119 = vset.pattern.permute.xlu1 %v1337_v15  ;;  %v544_v17 = vld [vmem:[#allocation9 + $0x70] sm:$0xff] }
  0x69   : > { %944 = vmatprep.subr.mxu0 %v351_v8  ;;  %470 = vadd.xlane.f32.xlu1 %v469_v10  ;;  %v545_v16 = vld [vmem:[#allocation9 + $0x78] sm:$0xff]  ;;  %v560_v19 = vld [vmem:[#allocation9 + $0xf0] sm:$0xff]  ;;  %v559_v21 = vld [vmem:[#allocation9 + $0xe8] sm:$0xff]  ;;  %s734_s23 = sshll.u32 %s324_s21, 4  ;;  %s901_s27 = sshll.u32 %s1320_s18, 8  ;;  %s1556_s23 = int_to_ptr.vmem [resolvable:$true] %s734_s23 }
  0x6a   : > { %v475_v14 = vsel %vm352_vm1, %v465_v11, 0.0  ;;  %945 = vmatpush3.msra.mxu0 %v351_v8  ;;  %1118 = vset.pattern.permute.xlu0 %v1337_v15  ;;  %v561_v18 = vld [vmem:[#allocation9 + $0xf8] sm:$0xff]  ;;  %v542_v22 = vld [vmem:[#allocation9 + $0x60] sm:$0xff]  ;;  %v540_v26 = vld [vmem:[#allocation9 + $0x50] sm:$0xff]  ;;  %s1561_s12 = scalar_lea.hbm %s1612_s4, %s901_s27  ;;  %s719_s26 = scalar_lea.sflag [#allocation6], %s1513_s0 }
  0x6b   : > { %946 = vmatprep.subr.mxu0 %v350_v12  ;;  %954 = vmatprep.subr.mxu1 %v561_v18  ;;  %v558_v23 = vld [vmem:[#allocation9 + $0xe0] sm:$0xff]  ;;  %v541_v24 = vld [vmem:[#allocation9 + $0x58] sm:$0xff]  ;;  %v556_v27 = vld [vmem:[#allocation9 + $0xd0] sm:$0xff]  ;;  %s1236_s18 = scalar_lea.vmem %s1556_s23, 256  ;;  %s1338_s8 = smov [#allocation12]  }
  0x6c   : > { %947 = vmatpush3.msra.mxu0 %v350_v12  ;;  %473 = vadd.xlane.f32.xlu0 %v472_v13  ;;  %v557_v25 = vld [vmem:[#allocation9 + $0xd8] sm:$0xff]  ;;  %v539_v28 = vld [vmem:[#allocation9 + $0x48] sm:$0xff]  ;;  %v538_v30 = vld [vmem:[#allocation9 + $0x40] sm:$0xff]  ;;  %p1237_p1 = scmp.ne.s32.totalorder %s1556_s23, %s1236_s18  ;;  %s1240_s10 = sshll.u32 %s1338_s8, 4  ;;  %s1241_s10 = int_to_ptr.vmem [resolvable:$false] %s1240_s10 }
  0x6d   : > { %476 = vadd.xlane.f32.xlu1 %v475_v14  ;;  %949 = vmatmul.mubr.msk.f32.vlgmr.msra.gmra.mxu0 %vm352_vm1, %v343_v3  ;;  %v555_v29 = vld [vmem:[#allocation9 + $0xc8] sm:$0xff]  ;;  %v554_v31 = vld [vmem:[#allocation9 + $0xc0] sm:$0xff]  ;;  %v537_v32 = vld [vmem:[#allocation9 + $0x38] sm:$0xff]  ;;  %s1242_s28 = scalar_lea.vmem %s1241_s10, 512  ;;  %p1243_p2 = scmp.lt.s32.totalorder %s1556_s23, %s1241_s10 }
  0x6e   : > { %951 = vmatprep.mubr.msk.f32.mxu0 %vm352_vm1, %v344_v2  ;;  %989 = vmatprep.subr.mxu0 %v545_v16  ;;  %v536_v33 = vld [vmem:[#allocation9 + $0x30] sm:$0xff]  ;;  %v553_v34 = vld [vmem:[#allocation9 + $0xb8] sm:$0xff]  ;;  %v535_v35 = vld [vmem:[#allocation9 + $0x28] sm:$0xff]  ;;  %p1238_p4 = pnand %p1237_p1, %p1462_p5  ;;  %p1244_p7 = scmp.lt.s32.totalorder %s1242_s28, %s1236_s18 }
  0x6f   : > { %990 = vmatpush3.msra.mxu0 %v545_v16  ;;  %955 = vmatpush3.msra.mxu1 %v561_v18  ;;  %v458_v36 = vld [vmem:[#allocation3] sm:$0xff]  ;;  %v459_v37 = vld [vmem:[#allocation3 + $0x8] sm:$0xff]  ;;  %v460_v42 = vld [vmem:[#allocation3 + $0x10] sm:$0xff] }
  0x70   : > { %991 = vmatprep.subr.mxu0 %v544_v17  ;;  %956 = vmatprep.subr.mxu1 %v560_v19  ;;  %v461_v43 = vld [vmem:[#allocation3 + $0x18] sm:$0xff]  ;;  %v552_v56 = vld [vmem:[#allocation9 + $0xb0] sm:$0xff]  ;;  %v534_v57 = vld [vmem:[#allocation9 + $0x20] sm:$0xff]  ;;  %p1239_p8 = pneg %p1238_p4  ;;  %p1245_p9 = por %p1244_p7, %p1243_p2 }
  0x71   : > { %952 = vmatmul.mubr.msk.f32.gmra.mxu0 %vm352_vm1, %v345_v7  ;;  %957 = vmatpush3.msra.mxu1 %v560_v19  ;;  %v551_v58 = vld [vmem:[#allocation9 + $0xa8] sm:$0xff]  ;;  %v533_v59 = vld [vmem:[#allocation9 + $0x18] sm:$0xff]  ;;  %v550_v61 = vld [vmem:[#allocation9 + $0xa0] sm:$0xff] }
  0x72   : > { %992 = vmatpush3.msra.mxu0 %v544_v17  ;;  %958 = vmatprep.subr.mxu1 %v559_v21  ;;  %v532_v62 = vld [vmem:[#allocation9 + $0x10] sm:$0xff]  ;;  %v549_v63 = vld [vmem:[#allocation9 + $0x98] sm:$0xff]  ;;  %v531_v0 = vld [vmem:[#allocation9 + $0x8] sm:$0xff]  ;;  %p1246_p11 = pnand %p1245_p9, %p1239_p8 }
  0x73   : > { %993 = vmatprep.subr.mxu0 %v543_v20  ;;  %959 = vmatpush3.msra.mxu1 %v559_v21  ;;  %v548_v2 = vld [vmem:[#allocation9 + $0x90] sm:$0xff]  ;;  %v530_v3 = vld [vmem:[#allocation9] sm:$0xff]  ;;  %v547_v4 = vld [vmem:[#allocation9 + $0x88] sm:$0xff] }
  0x74   : > { %994 = vmatpush3.msra.mxu0 %v543_v20  ;;  %960 = vmatprep.subr.mxu1 %v558_v23  ;;  %v546_v6 = vld [vmem:[#allocation9 + $0x80] sm:$0xff] }
  0x75   : > { %995 = vmatprep.subr.mxu0 %v542_v22  ;;  %961 = vmatpush3.msra.mxu1 %v558_v23 }
  0x76   : > { %996 = vmatpush3.msra.mxu0 %v542_v22  ;;  %962 = vmatprep.subr.mxu1 %v557_v25  ;;  %v713_v22 = vld [vmem:[#allocation10 + $0x8] sm:$0xff] }
  0x77   : > { %997 = vmatprep.subr.mxu0 %v541_v24  ;;  %963 = vmatpush3.msra.mxu1 %v557_v25 }
  0x78   : > { %998 = vmatpush3.msra.mxu0 %v541_v24  ;;  %964 = vmatprep.subr.mxu1 %v556_v27 }
  0x79   : > { %999 = vmatprep.subr.mxu0 %v540_v26  ;;  %965 = vmatpush3.msra.mxu1 %v556_v27 }
  0x7a   : > { %1000 = vmatpush3.msra.mxu0 %v540_v26  ;;  %966 = vmatprep.subr.mxu1 %v555_v29  ;;  %v712_v26 = vld [vmem:[#allocation10] sm:$0xff] }
  0x7b   : > { %1001 = vmatprep.subr.mxu0 %v539_v28  ;;  %967 = vmatpush3.msra.mxu1 %v555_v29 }
  0x7c   : > { %1002 = vmatpush3.msra.mxu0 %v539_v28  ;;  %968 = vmatprep.subr.mxu1 %v554_v31 }
  0x7d   : > { %1003 = vmatprep.subr.mxu0 %v538_v30  ;;  %969 = vmatpush3.msra.mxu1 %v554_v31 }
  0x7e   : > { %1004 = vmatpush3.msra.mxu0 %v538_v30  ;;  %970 = vmatprep.subr.mxu1 %v553_v34 }
  0x7f   : > { %1005 = vmatprep.subr.mxu0 %v537_v32  ;;  %971 = vmatpush3.msra.mxu1 %v553_v34 }
  0x80   : > { %1006 = vmatpush3.msra.mxu0 %v537_v32  ;;  %972 = vmatprep.subr.mxu1 %v552_v56 }
  0x81   : > { %1007 = vmatprep.subr.mxu0 %v536_v33  ;;  %973 = vmatpush3.msra.mxu1 %v552_v56 }
  0x82   : > { %1008 = vmatpush3.msra.mxu0 %v536_v33  ;;  %974 = vmatprep.subr.mxu1 %v551_v58 }
  0x83   : > { %1009 = vmatprep.subr.mxu0 %v535_v35  ;;  %975 = vmatpush3.msra.mxu1 %v551_v58 }
  0x84   : > { %1010 = vmatpush3.msra.mxu0 %v535_v35  ;;  %976 = vmatprep.subr.mxu1 %v550_v61 }
  0x85   : > { %1011 = vmatprep.subr.mxu0 %v534_v57  ;;  %977 = vmatpush3.msra.mxu1 %v550_v61 }
  0x86   : > { %1012 = vmatpush3.msra.mxu0 %v534_v57  ;;  %978 = vmatprep.subr.mxu1 %v549_v63 }
  0x87   : > { %1013 = vmatprep.subr.mxu0 %v533_v59  ;;  %979 = vmatpush3.msra.mxu1 %v549_v63 }
  0x88   : > { %1014 = vmatpush3.msra.mxu0 %v533_v59  ;;  %980 = vmatprep.subr.mxu1 %v548_v2 }
  0x89   : > { %1015 = vmatprep.subr.mxu0 %v532_v62  ;;  %981 = vmatpush3.msra.mxu1 %v548_v2 }
  0x8a   : > { %1016 = vmatpush3.msra.mxu0 %v532_v62  ;;  %982 = vmatprep.subr.mxu1 %v547_v4 }
  0x8b   : > { %1017 = vmatprep.subr.mxu0 %v531_v0  ;;  %983 = vmatpush3.msra.mxu1 %v547_v4 }
  0x8c   : > { %1018 = vmatpush3.msra.mxu0 %v531_v0  ;;  %984 = vmatprep.subr.mxu1 %v546_v6 }
  0x8d   : > { %1019 = vmatprep.subr.mxu0 %v530_v3  ;;  %985 = vmatpush3.msra.mxu1 %v546_v6 }
  0x8e   : > { %1020 = vmatpush3.msra.mxu0 %v530_v3 }
  0xf1   : > { %v468_v38 = vpop.xlane.xlu0 %467 }
  0xf2   : > { %v471_v39 = vpop.xlane.xlu1 %470  ;;  %v478_v40 = vadd.f32 %v468_v38, %v458_v36 }
  0xf3   : > { %v479_v41 = vadd.f32 %v471_v39, %v459_v37 }
  0xf4   : > { %483 = vst.msk [vmem:[#allocation3] sm:$0xff] %vm337_vm0, %v478_v40 }
  0xf5   : > { %484 = vst.msk [vmem:[#allocation3 + $0x8] sm:$0xff] %vm337_vm0, %v479_v41  ;;  %v474_v44 = vpop.xlane.xlu0 %473 }
  0xf6   : > { %v477_v45 = vpop.xlane.xlu1 %476  ;;  %v480_v46 = vadd.f32 %v474_v44, %v460_v42 }
  0xf7   : > { %v481_v47 = vadd.f32 %v477_v45, %v461_v43 }
  0xf8   : > { %485 = vst.msk [vmem:[#allocation3 + $0x10] sm:$0xff] %vm337_vm0, %v480_v46 }
  0xf9   : > { %486 = vst.msk [vmem:[#allocation3 + $0x18] sm:$0xff] %vm337_vm0, %v481_v47 }
  0xfb   : > { %v490_v48 = vld [vmem:[#allocation3] sm:$0xff] }
  0xfc   : > { %v494_v49 = vmax.f32 %v490_v48, 1e-12  ;;  %v491_v50 = vld [vmem:[#allocation3 + $0x8] sm:$0xff] }
  0xfd   : > { %v495_v53 = vmax.f32 %v491_v50, 1e-12 }
  0xfe   : > { %1120 = vrcp.f32 %v494_v49 }
  0xff   : > { %v492_v51 = vld [vmem:[#allocation3 + $0x10] sm:$0xff] }
 0x100   : > { %v496_v52 = vmax.f32 %v492_v51, 1e-12  ;;  %v493_v54 = vld [vmem:[#allocation3 + $0x18] sm:$0xff] }
 0x101   : > { %v497_v55 = vmax.f32 %v493_v54, 1e-12 }
 0x102   : > { %1122 = vrcp.f32 %v496_v52 }
 0x103   : > { %1124 = vrcp.f32 %v495_v53 }
 0x104   : > { %1126 = vrcp.f32 %v497_v55 }
 0x10b   : > { %v1121_v60 = vpop.eup %1120 }
 0x10c   : > { %508 = vperm.xlu0 %1118, %v1121_v60  }
 0x10f   : > { %v1123_v1 = vpop.eup %1122 }
 0x110   : > { %518 = vperm.xlu1 %1119, %v1123_v1   ;;  %v1125_v5 = vpop.eup %1124 }
 0x111   : > { %v1127_v7 = vpop.eup %1126 }
 0x114   : > { %513 = vperm.xlu1 %1119, %v1125_v5  }
 0x118   : > { %523 = vperm.xlu1 %1119, %v1127_v7  }
 0x12d   : > { %v950_v8 = vpop.f32.mrf.mxu0 }
 0x12f   : > { %v431_v9 = vpop.f32.mrf.mxu0 }
 0x131   : > { %v953_v10 = vpop.f32.mrf.mxu0 }
 0x133   : > { %v441_v13 = vpop.f32.mrf.mxu0 }
 0x187   : > { %v509_v11 = vpop.permute.xlu0 %508 }
 0x188   : > { %v526_v12 = vmul.f32 %v509_v11, %v431_v9 }
 0x18a   : > { %1021 = vmatprep.mubr.f32.mxu0 %v526_v12 }
 0x18b   : > { %v519_v14 = vpop.permute.xlu1 %518 }
 0x18c   : > { %v528_v15 = vmul.f32 %v519_v14, %v441_v13 }
 0x18e   : > { %986 = vmatprep.mubr.f32.mxu1 %v528_v15 }
 0x18f   : > { %v514_v16 = vpop.permute.xlu1 %513 }
 0x190   : > { %v527_v17 = vmul.f32 %v950_v8, %v514_v16 }
 0x192   : > { %1022 = vmatmul.mubr.f32.vlgmr.msra.gmra.mxu0 %v527_v17 }
 0x193   : > { %v524_v18 = vpop.permute.xlu1 %523 }
 0x194   : > { %v529_v19 = vmul.f32 %v953_v10, %v524_v18 }
 0x196   : > { %987 = vmatmul.mubr.f32.vlgmr.msra.gmra.mxu1 %v529_v19 }
 0x252   : > { %v1023_v20 = vpop.f32.mrf.mxu0 }
 0x254   : > { %v703_v24 = vpop.f32.mrf.mxu0 }
 0x256   : > { %v988_v21 = vpop.f32.mrf.mxu1 }
 0x257   : > { %v709_v23 = vadd.f32 %v1023_v20, %v988_v21 }
 0x258   : > { %v628_v25 = vpop.f32.mrf.mxu1 }
 0x259   : > { %v715_v27 = vadd.f32 %v713_v22, %v709_v23  ;;  %v704_v28 = vadd.f32 %v703_v24, %v628_v25 }
 0x25b   : > { %717 = vst [vmem:[%s324_s21 + $0x8] sm:$0xff] %v715_v27  ;;  %v714_v29 = vadd.f32 %v712_v26, %v704_v28 }
 0x25d   : > { %716 = vst [vmem:[%s324_s21] sm:$0xff] %v714_v29 }
 0x25e   : > { %1249 = shalt.err (!%p1246_p11)
}
 0x25f   : > { %s1250_s29 = scalar_lea.hbm %s1561_s12, 256  ;;  %s1254_s9 = scalar_lea.hbm %s1612_s4, 1024 }
 0x260   : > { %p1251_p12 = scmp.ne.s32.totalorder %s1561_s12, %s1250_s29  ;;  %p1255_p0 = scmp.lt.s32.totalorder %s1561_s12, %s1612_s4 }
 0x261   : > { %p1256_p10 = scmp.lt.s32.totalorder %s1254_s9, %s1250_s29 }
 0x262   : > { %p1252_p13 = pnand %p1251_p12, %p1462_p5 }
 0x263   : > { %p1257_p1 = por %p1256_p10, %p1255_p0 }
 0x264   : > { %p1253_p3 = pneg %p1252_p13 }
 0x266   : > { %p1258_p4 = pnand %p1257_p1, %p1253_p3 }
 0x268   : > { %1261 = shalt.err (!%p1258_p4)
}
 0x269   : > { %s1339_s6 = smov 128   ;;  %s1340_s3 = smov 8  }
 0x26a   : > { %1036 = dma.vmem_to_hbm [thread:$0]  (%p1462_p5), %s1556_s23, 256, %s1561_s12, %s719_s26, %s1339_s6, %s1339_s6, %s1340_s3  }
 0x26b PF: > { %p1061_p8 = scmp.ge.s32.totalorder %s1328_s20, 2  ;;  %s749_s25 = sand.u32 1, %s1308_s15  }
 0x26c   : > { %s750_s7 = scalar_lea.sflag [#allocation6], %s749_s25 }
 0x26d   : > { %p1053_p2 = pnand %p1061_p8, %p1411_p6 }
 0x26f   : > { %p1054_p7 = pneg %p1053_p2 }
 0x271   : > { %1303 = dma.done.wait (%p1054_p7), %s750_s7, 256  }
 0x272   : > { %1305 = vsyncadd (%p1054_p7), %s750_s7, 4294967040  ;;  %s24_s20 = sadd.s32 1, %s1328_s20   ;;  %s1633_s13 = sld [smem:[#allocation18_spill]] }
 0x273   : > { %p21_p9 = scmp.ge.s32.totalorder %s24_s20, 6   ;;  %s1634_s17 = sld [smem:[#allocation20_spill]] }
 0x274   : > { %s1635_s22 = sld [smem:[#allocation19_spill]]  ;;  %s1636_s15 = smov %s1312_s16 }
 0x275   : > { %s1638_s18 = smov %s1324_s19 }
 0x276   :  { %23 = sbr.rel (!%p21_p9) target bundleno = 13 (0xd), region = 111 }
 0x278   : > { %s1637_s16 = smov %s1633_s13 }
 0x27a   : > { %s1639_s19 = smov %s1635_s22 }
 0x27b   :  { %755 = vsyncpa [#allocation5], 1 }
 0x27c   :  { %757 = vsyncpa [#allocation5 + $0x1], 1 }
 0x27d   :  { %758 = vsyncpa [#allocation8], 1 }
 0x27e   :  { %760 = vsyncpa [#allocation8 + $0x1], 1 }
 0x27f   :  { %761 = vsyncpa [#allocation11], 1 }
 0x280   :  { %762 = vsyncpa [#allocation6], 1 }
 0x281   :  { %764 = vsyncpa [#allocation6 + $0x1], 1 }

</bundles_post_ra>
